<compile_context>
chip_gen: v7x
topology: tpu7x:2x2x1
jax: 0.10.0
libtpu: 0.0.40
codegen_flags: <defaults>
</compile_context>

<pallas_src>
import jax
import jax.numpy as jnp
from jax.experimental import pallas as pl
from jax.experimental.pallas import tpu as pltpu


def _prepend_cls_kernel(cls_ref, x_ref, o_ref):
    # cls_ref: (1, 1, TD)     -- class-token lane tile (constant across batch steps)
    # x_ref  : (TB, S, TD)    -- TB batch elements of the input
    # o_ref  : (TB, S+1, TD)  -- row 0 = cls token, rows 1..S = x
    tb = o_ref.shape[0]
    o_ref[:, 0:1, :] = jnp.broadcast_to(cls_ref[...], (tb, 1, cls_ref.shape[-1]))
    o_ref[:, 1:, :] = x_ref[...]


def _vmem_limit_bytes():
    """Generation-aware VMEM request: <= 3/4 of physical, never more than 48 MiB."""
    try:
        cap = pltpu.get_tpu_info().vmem_capacity_bytes
    except Exception:
        cap = 64 * 1024 * 1024  # conservative fallback: v7x per-TensorCore VMEM
    return min(48 * 1024 * 1024, (cap * 3) // 4)


def _pick_tiles(B, S, D, itemsize, budget):
    """Pick (TB, TD): batch-tile and embedding-tile sizes.

    Prefers full D (contiguous per-batch DMA), then the largest divisor of B
    whose double-buffered (x + out + cls) footprint fits `budget`, while keeping
    the grid >= 2 steps so megacore (v7x, 2 TCs) can shard it.
    """

    def step_bytes(tb, td):
        # x tile + out tile + cls tile, each double-buffered by the pipeline.
        return 2 * itemsize * (tb * S * td + tb * (S + 1) * td + td)

    # --- D tile: full D if it's a multiple of 128 and fits; else largest
    # multiple-of-128 divisor of D; else full-extent last dim (always legal).
    if D % 128 == 0:
        cands = sorted(
            (c for c in range(128, D + 1, 128) if D % c == 0), reverse=True
        )
        d_tile = cands[-1]
        for c in cands:
            if step_bytes(1, c) <= budget:
                d_tile = c
                break
    else:
        d_tile = D
    n_d = D // d_tile

    # --- Batch tile: largest divisor of B that fits the budget, keeping >= 2
    # grid steps overall when B > 1 (so both v7x TensorCores get work).
    tb = 1
    for c in range(B, 0, -1):
        if B % c != 0:
            continue
        if B > 1 and n_d * (B // c) < 2:
            continue
        if step_bytes(c, d_tile) <= budget:
            tb = c
            break
    return tb, d_tile


def prepend_class_token(x: jax.Array, cls_token: jax.Array, tb=None, d_tile=None) -> jax.Array:
    """x: [B, S, D], cls_token: [1, 1, D] -> [B, S+1, D]"""
    B, S, D = x.shape
    assert cls_token.shape == (1, 1, D)
    cls_token = cls_token.astype(x.dtype)
    itemsize = jnp.dtype(x.dtype).itemsize

    vmem_limit = _vmem_limit_bytes()
    budget = max(vmem_limit - 8 * 1024 * 1024, 8 * 1024 * 1024)
    auto_tb, auto_td = _pick_tiles(B, S, D, itemsize, budget)
    if tb is None:
        tb = auto_tb
    if d_tile is None:
        d_tile = auto_td
    assert B % tb == 0, "batch tile must evenly divide batch"
    assert D % d_tile == 0, "d_tile must evenly divide d_model"
    n_b = B // tb
    n_d = D // d_tile

    # Pure-bandwidth op: tell XLA so it can overlap with neighboring compute.
    bytes_accessed = itemsize * (B * S * D + D + B * (S + 1) * D)
    cost = pl.CostEstimate(flops=0, transcendentals=0, bytes_accessed=bytes_accessed)

    return pl.pallas_call(
        _prepend_cls_kernel,
        out_shape=jax.ShapeDtypeStruct((B, S + 1, D), x.dtype),
        # Batch innermost: the cls block index (0,0,d) is constant across
        # consecutive steps, so its DMA is skipped after the first fetch.
        grid=(n_d, n_b),
        in_specs=[
            pl.BlockSpec((1, 1, d_tile), lambda d, b: (0, 0, d)),
            pl.BlockSpec((tb, S, d_tile), lambda d, b: (b, 0, d)),
        ],
        out_specs=pl.BlockSpec((tb, S + 1, d_tile), lambda d, b: (b, 0, d)),
        compiler_params=pltpu.CompilerParams(
            dimension_semantics=("parallel", "parallel"),
            vmem_limit_bytes=vmem_limit,
        ),
        cost_estimate=cost,
    )(cls_token, x)


def _reference(x, cls_token):
    B = x.shape[0]
    return jnp.concatenate(
        [jnp.broadcast_to(cls_token.astype(x.dtype), (B, 1, x.shape[-1])), x], axis=1
    )


if __name__ == "__main__":
    key = jax.random.PRNGKey(0)
    k_cls, k_x = jax.random.split(key)

    # Small shapes consistent with the module: batch=2, seq=8, d_model=32.
    B, S, D = 2, 8, 32
    # Matches nn.init.normal_(std=1e-6) on a zeros(1, 1, d_model) parameter.
    cls_token = jax.random.normal(k_cls, (1, 1, D), dtype=jnp.float32) * 1e-6
    x = jax.random.normal(k_x, (B, S, D), dtype=jnp.float32)

    out = jax.block_until_ready(prepend_class_token(x, cls_token))
    assert out.shape == (B, S + 1, D)
    assert jnp.allclose(out, _reference(x, cls_token)), "mismatch (small-D path)"

    # Lane-dense full-D path (D multiple of 128).
    D2 = 256
    k_cls2, k_x2 = jax.random.split(k_x)
    cls2 = jax.random.normal(k_cls2, (1, 1, D2), dtype=jnp.float32) * 1e-6
    x2 = jax.random.normal(k_x2, (B, S, D2), dtype=jnp.float32)
    out2 = jax.block_until_ready(prepend_class_token(x2, cls2))
    assert out2.shape == (B, S + 1, D2)
    assert jnp.allclose(out2, _reference(x2, cls2)), "mismatch (full-D path)"

    # Batch-tiled path (TB > 1 exercises the in-kernel cls broadcast).
    B3, S3, D3 = 8, 16, 256
    k_cls3, k_x3 = jax.random.split(k_x2)
    cls3 = jax.random.normal(k_cls3, (1, 1, D3), dtype=jnp.float32) * 1e-6
    x3 = jax.random.normal(k_x3, (B3, S3, D3), dtype=jnp.float32)
    out3 = jax.block_until_ready(prepend_class_token(x3, cls3))
    assert out3.shape == (B3, S3 + 1, D3)
    assert jnp.allclose(out3, _reference(x3, cls3)), "mismatch (batch-tiled path)"

    print("KERNEL_OK")
</pallas_src>

<mosaic_0001>
module attributes {stable_mosaic.version = 11 : i64} {
  func.func @_prepend_cls_kernel(%arg0: i32, %arg1: i32, %arg2: memref<1x1x32xf32, #tpu.memory_space<vmem>>, %arg3: memref<1x8x32xf32, #tpu.memory_space<vmem>>, %arg4: memref<1x9x32xf32, #tpu.memory_space<vmem>>) attributes {dimension_semantics = [#tpu.dimension_semantics<parallel>, #tpu.dimension_semantics<parallel>], iteration_bounds = array<i64: 1, 2>, scalar_prefetch = 0 : i64, scratch_operands = 0 : i64, tpu.core_type = #tpu.core_type<tc>, window_params = [{transform_indices = @transform_0, window_bounds = array<i64: 1, 1, 32>}, {transform_indices = @transform_1, window_bounds = array<i64: 1, 8, 32>}, {transform_indices = @transform_2, window_bounds = array<i64: 1, 9, 32>}]} {
    %c0 = arith.constant 0 : index
    %c0_0 = arith.constant 0 : index
    %c0_1 = arith.constant 0 : index
    %0 = vector.load %arg2[%c0, %c0_0, %c0_1] : memref<1x1x32xf32, #tpu.memory_space<vmem>>, vector<1x1x32xf32>
    %c0_2 = arith.constant 0 : index
    %c0_3 = arith.constant 0 : index
    %c0_4 = arith.constant 0 : index
    %1 = vector.load %arg4[%c0_2, %c0_3, %c0_4] : memref<1x9x32xf32, #tpu.memory_space<vmem>>, vector<1x1x32xf32>
    tpu.vector_store %arg4[%c0_2, %c0_3, %c0_4], %0 {strides = array<i32>} : memref<1x9x32xf32, #tpu.memory_space<vmem>>, vector<1x1x32xf32>,
    %c0_5 = arith.constant 0 : index
    %c0_6 = arith.constant 0 : index
    %c0_7 = arith.constant 0 : index
    %2 = vector.load %arg3[%c0_5, %c0_6, %c0_7] : memref<1x8x32xf32, #tpu.memory_space<vmem>>, vector<1x8x32xf32>
    %c0_8 = arith.constant 0 : index
    %c1 = arith.constant 1 : index
    %c0_9 = arith.constant 0 : index
    %3 = vector.load %arg4[%c0_8, %c1, %c0_9] : memref<1x9x32xf32, #tpu.memory_space<vmem>>, vector<1x8x32xf32>
    tpu.vector_store %arg4[%c0_8, %c1, %c0_9], %2 {strides = array<i32>} : memref<1x9x32xf32, #tpu.memory_space<vmem>>, vector<1x8x32xf32>,
    return
  }
  func.func @transform_0(%arg0: i32, %arg1: i32) -> (i32, i32, i32) {
    %c0_i32 = arith.constant 0 : i32
    %c0_i32_0 = arith.constant 0 : i32
    %c0_i32_1 = arith.constant 0 : i32
    return %c0_i32, %c0_i32_0, %arg0 : i32, i32, i32
  }
  func.func @transform_1(%arg0: i32, %arg1: i32) -> (i32, i32, i32) {
    %c0_i32 = arith.constant 0 : i32
    %c0_i32_0 = arith.constant 0 : i32
    return %arg1, %c0_i32, %arg0 : i32, i32, i32
  }
  func.func @transform_2(%arg0: i32, %arg1: i32) -> (i32, i32, i32) {
    %c0_i32 = arith.constant 0 : i32
    %c0_i32_0 = arith.constant 0 : i32
    return %arg1, %c0_i32, %arg0 : i32, i32, i32
  }
}

</mosaic_0001>

<bundles_post_ra>
// kernel: tpu_custom_call.1
= control target key start
LH: loop header
LB: loop body
LE: loop exit
PB: predicated region body
PF: predicated region fallthrough
CT: control target
= control target key end

     0   :  { %7 = vsyncpa [#allocation3], 0  ;;  %s689_s0 = inlined_call_operand.hbm [shape: f32[1,1,32], index: 0, kind: input, shape index: {}]   ;;  %s690_s1 = inlined_call_operand.hbm [shape: f32[2,8,32], index: 1, kind: input, shape index: {}]   ;;  %s691_s2 = inlined_call_operand.vmem [shape: f32[2,9,32], index: 2, kind: output, shape index: {}]  }
   0x1   :  { %8 = vsyncpa [#allocation5], 0 }
   0x2   :  { %10 = vsyncpa [#allocation5 + $0x1], 0  ;;  %s526_s9 = smov 0   ;;  %s528_s10 = smov 0  }
   0x3   :  { %s530_s11 = smov 0   ;;  %s532_s12 = smov 0  }
   0x4   :  { %s534_s13 = smov 0   ;;  %s536_s14 = smov 0  }
   0x5 LB: > { %s314_s15 = sadd.s32 4294967295, %s507_s14   ;;  %p76_p0 = scmp.ne.s32.totalorder %s491_s10, %s487_s9  ;;  %s507_s14 = sphi %s536_s14, %s16_s14   ;;  %s503_s13 = sphi %s534_s13, %s710_s13   ;;  %s499_s12 = sphi %s532_s12, %s709_s12   ;;  %s495_s11 = sphi %s530_s11, %s708_s11   ;;  %s491_s10 = sphi %s528_s10, %s707_s10   ;;  %s487_s9 = sphi %s526_s9, %s706_s9  }
   0x6   : > { %p556_p1 = scmp.eq.s32.totalorder %s314_s15, 0  ;;  %p316_p2 = scmp.ge.s32.totalorder %s507_s14, 1 }
   0x7   : > { %p115_p3 = scmp.lt.s32.totalorder %s507_s14, 3  ;;  %s509_s19 = smov [#allocation2]  }
   0x8   : > { %s696_s16 = scalar_select %p556_p1, 1, 0 }
   0x9   : > { %p564_p4 = por %p556_p1, %p76_p0  ;;  %p568_p5 = pnand %p316_p2, %p115_p3 }
   0xa   : > { %s130_s20 = sshll.u32 %s509_s19, 4  ;;  %s25_s22 = sadd.s32 1, %s503_s13  ;;  %s131_s20 = int_to_ptr.vmem [resolvable:$true] %s130_s20 }
   0xb   : > { %s697_s17 = scalar_select %p564_p4, 1, 0 }
   0xc   : > { %s698_s18 = scalar_select %p568_p5, 1, 0 }
   0xd   : > { %p335_p6 = pneg %p568_p5  ;;  %s63_s23 = sadd.s32 1, %s495_s11 }
   0xe   : > { %p582_p8 = scmp.ge.s32.totalorder %s25_s22, 2  ;;  %s395_s27 = scalar_lea.hbm %s689_s0, 16 }
   0xf   : > { %p576_p7 = pnand %p335_p6, %p556_p1  ;;  %p396_p9 = scmp.ne.s32.totalorder %s689_s0, %s395_s27 }
  0x10   : > { %s700_s24 = scalar_select %p582_p8, 1, 0 }
  0x11   : > { %p397_p10 = pneg %p576_p7  ;;  %p402_p13 = scmp.lt.u32.totalorder %s395_s27, %s689_s0 }
  0x13   : > { %p398_p11 = pnand %p397_p10, %p396_p9 }
  0x15   : > { %p399_p12 = pneg %p398_p11 }
  0x17   : > { %p404_p0 = pnand %p402_p13, %p399_p12 }
  0x19   : > { %407 = shalt.err (!%p404_p0)
}
  0x1a   : > { %s408_s4 = scalar_lea.vmem %s131_s20, 16  ;;  %s415_s5 = scalar_lea.vmem %s131_s20, 32 }
  0x1b   : > { %p409_p2 = scmp.ne.s32.totalorder %s131_s20, %s408_s4  ;;  %p416_p4 = scmp.lt.s32.totalorder %s131_s20, %s131_s20 }
  0x1c   : > { %p417_p1 = scmp.lt.s32.totalorder %s415_s5, %s408_s4 }
  0x1d   : > { %p411_p3 = pnand %p409_p2, %p397_p10 }
  0x1e   : > { %p418_p5 = por %p417_p1, %p416_p4 }
  0x1f   : > { %p412_p6 = pneg %p411_p3 }
  0x21   : > { %p419_p8 = pnand %p418_p5, %p412_p6 }
  0x23   : > { %422 = shalt.err (!%p419_p8)
}
  0x24   : > { %338 = dma.hbm_to_vmem [thread:$0]  (!%p576_p7), %s689_s0, 16, %s131_s20, [#allocation3]  }
  0x25   : > { %p701_p9 = scmp.ne.s32.totalorder %s700_s24, 0  ;;  %p70_p1 = scmp.ne.s32.totalorder %s495_s11, %s491_s10 }
  0x26   : > { %p71_p4 = scmp.eq.s32.totalorder %s507_s14, 0  ;;  %p344_p5 = scmp.lt.s32.totalorder %s507_s14, 2 }
  0x27   : > { %s712_s22 = smov (%p701_p9, %s25_s22), 0  ;;  %s141_s9 = sand.u32 1, %s495_s11  }
  0x28   : > { %s58_s8 = ssub.s32 %s503_s13, %s712_s22  ;;  %p72_p10 = por %p71_p4, %p70_p1 }
  0x29   : > { %p61_p8 = scmp.eq.s32.totalorder %s58_s8, 0  ;;  %s320_s15 = sshll.u32 %s503_s13, 7 }
  0x2a   : > { %s319_s21 = sshll.u32 %s141_s9, 3  ;;  %s622_s20 = scalar_lea.hbm %s690_s1, %s320_s15 }
  0x2b   : > { %s617_s19 = scalar_select %p61_p8, %s495_s11, %s63_s23  }
  0x2c   : > { %s145_s24 = scalar_lea.vmem [#allocation4], %s319_s21  ;;  %p624_p7 = pnand %p344_p5, %p72_p10 }
  0x2d   : > { %s153_s27 = sshll.u32 %s145_s24, 4  ;;  %s142_s23 = scalar_lea.sflag [#allocation5], %s141_s9  ;;  %s628_s27 = int_to_ptr.vmem [resolvable:$true] %s153_s27 }
  0x2e   : > { %s423_s29 = scalar_lea.hbm %s622_s20, 128  ;;  %p425_p12 = pneg %p624_p7 }
  0x2f   : > { %p424_p11 = scmp.ne.s32.totalorder %s622_s20, %s423_s29  ;;  %s428_s4 = scalar_lea.hbm %s690_s1, 256 }
  0x30   : > { %p429_p2 = scmp.lt.u32.totalorder %s622_s20, %s690_s1  ;;  %p430_p3 = scmp.lt.u32.totalorder %s428_s4, %s423_s29 }
  0x31   : > { %p426_p13 = pnand %p425_p12, %p424_p11  ;;  %p432_p9 = scmp.lt.u32.totalorder %s423_s29, %s622_s20 }
  0x32   : > { %p431_p6 = por %p430_p3, %p429_p2 }
  0x33   : > { %p427_p0 = pneg %p426_p13 }
  0x34   : > { %p433_p1 = por %p432_p9, %p431_p6 }
  0x36   : > { %p434_p4 = pnand %p433_p1, %p427_p0 }
  0x38   : > { %437 = shalt.err (!%p434_p4)
}
  0x39   : > { %s438_s7 = scalar_lea.vmem %s628_s27, 128  ;;  %s510_s8 = smov [#allocation4]  }
  0x3a   : > { %p439_p5 = scmp.ne.s32.totalorder %s628_s27, %s438_s7  ;;  %s443_s9 = sshll.u32 %s510_s8, 4  ;;  %s444_s9 = int_to_ptr.vmem [resolvable:$false] %s443_s9 }
  0x3b   : > { %s445_s15 = scalar_lea.vmem %s444_s9, 256  ;;  %p446_p11 = scmp.lt.s32.totalorder %s628_s27, %s444_s9 }
  0x3c   : > { %p441_p8 = pnand %p439_p5, %p425_p12  ;;  %p447_p13 = scmp.lt.s32.totalorder %s445_s15, %s438_s7 }
  0x3e   : > { %p442_p10 = pneg %p441_p8  ;;  %p448_p2 = por %p447_p13, %p446_p11 }
  0x40   : > { %p449_p3 = pnand %p448_p2, %p442_p10 }
  0x42   : > { %452 = shalt.err (!%p449_p3)
}
  0x43   : > { %342 = dma.hbm_to_vmem [thread:$0]  (!%p624_p7), %s622_s20, 128, %s628_s27, %s142_s23  }
  0x44   : > { %p703_p0 = scmp.ne.s32.totalorder %s698_s18, 0 }
  0x45   : > { %p704_p12 = scmp.ne.s32.totalorder (!%p703_p0), %s696_s16, 0 }
  0x46   : > { %162 = sbr.rel (%p703_p0) target bundleno = 89 (0x59), region = 28 }
  0x4d   : > { %478 = dma.done.wait (%p704_p12), [#allocation3], 16  }
  0x4e   : > { %480 = vsyncadd (%p704_p12), [#allocation3], 4294967280  ;;  %s168_s21 = sand.u32 1, %s491_s10   ;;  %p705_p6 = scmp.ne.s32.totalorder %s697_s17, 0 }
  0x4f   : > { %s323_s25 = sshll.u32 %s168_s21, 3  ;;  %s169_s26 = scalar_lea.sflag [#allocation5], %s168_s21 }
  0x50   : > { %s172_s24 = scalar_lea.vmem [#allocation4], %s323_s25 }
  0x51   : > { %482 = dma.done.wait (%p705_p6), %s169_s26, 128  }
  0x52   : > { %484 = vsyncadd (%p705_p6), %s169_s26, 4294967168  ;;  %p196_p7 = scmp.lt.s32.totalorder %s499_s12, 1  ;;  %vm205_vm0 = vcmask 253952   ;;  %vm208_vm1 = vcmask 261120   ;;  %v204_v0 = vld [vmem:[#allocation2] sm:$0x1] }
  0x53   : > { %v207_v1 = vld [vmem:[%s172_s24] sm:$0xff] }
  0x54   : > { %s714_s12 = smov (!%p196_p7, %s499_s12), 1 }
  0x55   : > { %s328_s18 = sshll.u32 %s714_s12, 4 }
  0x56   : > { %s203_s16 = scalar_lea.vmem %s691_s2, %s328_s18 }
  0x57   : > { %206 = vst.msk [vmem:[%s203_s16] sm:$0x1] %vm205_vm0, %v204_v0 }
  0x58   : > { %209 = vst.msk [vmem:[%s203_s16 + $0x1] sm:$0xff] %vm208_vm1, %v207_v1 }
  0x59 PF: > { %s16_s14 = sadd.s32 1, %s507_s14   ;;  %s706_s9 = smov %s491_s10 }
  0x5a   : > { %p13_p9 = scmp.ge.s32.totalorder %s16_s14, 4   ;;  %s707_s10 = smov %s495_s11 }
  0x5b   : > { %s708_s11 = smov %s617_s19  ;;  %s709_s12 = smov %s503_s13 }
  0x5c   : > { %s710_s13 = smov %s712_s22  ;;  %15 = sbr.rel (!%p13_p9) target bundleno = 5 (0x5), region = 74 }
  0x63   :  { %237 = vsyncpa [#allocation3], 1 }
  0x64   :  { %239 = vsyncpa [#allocation3 + $0x1], 1 }
  0x65   :  { %240 = vsyncpa [#allocation5], 1 }
  0x66   :  { %242 = vsyncpa [#allocation5 + $0x1], 1 }

</bundles_post_ra>
